<compile_context>
chip_gen: v7x
topology: tpu7x:2x2x1
jax: 0.10.0
libtpu: 0.0.40
codegen_flags: <defaults>
</compile_context>

<pallas_src>
import math

import jax
import jax.numpy as jnp
from jax.experimental import pallas as pl
from jax.experimental.pallas import tpu as pltpu

_LANE = 128
_SUBLANE = 8


def _round_up(x, m):
    return ((x + m - 1) // m) * m


def _pad_axis(x, target, axis):
    pad = target - x.shape[axis]
    if pad <= 0:
        return x
    cfg = [(0, 0)] * x.ndim
    cfg[axis] = (0, pad)
    return jnp.pad(x, cfg)


def _mlp_kernel(*refs):
    """Fused MLP over one batch tile.

    refs = (xc, xp, w0c, w0p, b0, [w_i, b_i] * n_rest, out)
      xc : [TB, Dc]        xp : [TB, Dp]           (true feature widths)
      w0c: [Dc, D0_pad]    w0p: [Dp, D0_pad]       b*: [1, D*]
      out: [TB, out_dim]                           (true output width)
    """
    xc_ref, xp_ref, w0c_ref, w0p_ref, b0_ref = refs[:5]
    out_ref = refs[-1]
    rest = refs[5:-1]
    n_rest = len(rest) // 2

    # Layer 0 — the torch.cat is absorbed by splitting W0: two MXU pushes
    # accumulating into the same f32 result.  Narrow K is fine on the MXU.
    h = jnp.dot(xc_ref[...], w0c_ref[...], preferred_element_type=jnp.float32)
    h = h + jnp.dot(xp_ref[...], w0p_ref[...], preferred_element_type=jnp.float32)
    h = h + b0_ref[...]
    if n_rest > 0:
        h = jnp.maximum(h, 0.0)

    # Remaining layers — intermediates stay in vregs/VMEM, never touch HBM.
    for i in range(n_rest):
        w_ref = rest[2 * i]
        b_ref = rest[2 * i + 1]
        h = jnp.dot(h.astype(w_ref.dtype), w_ref[...],
                    preferred_element_type=jnp.float32) + b_ref[...]
        if i < n_rest - 1:
            h = jnp.maximum(h, 0.0)

    out_ref[...] = h.astype(out_ref.dtype)


def init_classifier_params(key, compound_dim, protein_dim, hidden_dim, out_dim):
    """nn.Linear-style init (uniform +/- 1/sqrt(fan_in)); W stored as [in, out]."""
    dims = [compound_dim + protein_dim] + list(hidden_dim) + [out_dim]
    params = []
    for i in range(len(dims) - 1):
        fan_in, fan_out = dims[i], dims[i + 1]
        key, kw, kb = jax.random.split(key, 3)
        bound = 1.0 / math.sqrt(fan_in)
        w = jax.random.uniform(kw, (fan_in, fan_out), jnp.float32, -bound, bound)
        b = jax.random.uniform(kb, (fan_out,), jnp.float32, -bound, bound)
        params.append((w, b))
    return params


def pad_classifier_params(params, compound_dim, *, compute_dtype=jnp.bfloat16):
    """One-time prep:
      * split W0 into compound/protein halves (eliminates torch.cat),
      * keep layer-0 contraction and the FINAL output dim at their true size
        (no HBM-side padding of streamed dims),
      * pad only the internal hidden dims to 128 lanes (weights are tiny and
        VMEM-resident, padded zeros contribute exactly zero),
      * cast weights to compute_dtype; biases stay f32 (added in f32)."""
    n_layers = len(params)
    w0, b0 = params[0]
    protein_dim = w0.shape[0] - compound_dim
    d0 = w0.shape[1]
    d0_pad = d0 if n_layers == 1 else _round_up(d0, _LANE)

    w0c = _pad_axis(w0[:compound_dim], d0_pad, 1).astype(compute_dtype)
    w0p = _pad_axis(w0[compound_dim:], d0_pad, 1).astype(compute_dtype)
    b0p = _pad_axis(b0.reshape(1, -1), d0_pad, 1).astype(jnp.float32)

    rest = []
    prev_pad = d0_pad
    for li, (w, b) in enumerate(params[1:], start=1):
        is_last = li == n_layers - 1
        dout = w.shape[1]
        dout_pad = dout if is_last else _round_up(dout, _LANE)
        wp = _pad_axis(_pad_axis(w, prev_pad, 0), dout_pad, 1).astype(compute_dtype)
        bp = _pad_axis(b.reshape(1, -1), dout_pad, 1).astype(jnp.float32)
        rest.append((wp, bp))
        prev_pad = dout_pad

    return dict(
        w0c=w0c,
        w0p=w0p,
        b0=b0p,
        rest=rest,
        compound_dim=compound_dim,
        protein_dim=protein_dim,
        out_dim=params[-1][0].shape[1],
        compute_dtype=compute_dtype,
    )


def classifier_forward(padded_params, compound_feature, protein_feature, *,
                       batch_tile=1024):
    pp = padded_params
    compute_dtype = pp["compute_dtype"]
    B = compound_feature.shape[0]
    dc = pp["compound_dim"]
    dp = pp["protein_dim"]
    d_out = pp["out_dim"]

    # Batch tile: multiple of 8 sublanes.  Big tiles amortize the per-step
    # pipeline overhead (v5e/v6e), but keep >= 2 grid steps when the batch
    # allows so the "parallel" axis shards across v7x's 2 TensorCores.
    b_rounded = _round_up(B, _SUBLANE)
    tb = min(batch_tile, _round_up(pl.cdiv(b_rounded, 2), _SUBLANE))
    tb = max(_SUBLANE, tb)
    b_pad = _round_up(B, tb)
    grid = b_pad // tb

    # Inputs keep their TRUE feature width in HBM (no lane padding): a block
    # whose last dim equals the full array dim is legal, and this is where
    # almost all of the streamed bytes are.
    xc = _pad_axis(compound_feature, b_pad, 0).astype(compute_dtype)
    xp = _pad_axis(protein_feature, b_pad, 0).astype(compute_dtype)

    # Weight/bias index_maps return the same block every grid step -> DMA'd
    # once, VMEM-resident across the batch grid.
    inputs = [xc, xp, pp["w0c"], pp["w0p"], pp["b0"]]
    in_specs = [
        pl.BlockSpec((tb, dc), lambda i: (i, 0)),
        pl.BlockSpec((tb, dp), lambda i: (i, 0)),
        pl.BlockSpec(pp["w0c"].shape, lambda i: (0, 0)),
        pl.BlockSpec(pp["w0p"].shape, lambda i: (0, 0)),
        pl.BlockSpec(pp["b0"].shape, lambda i: (0, 0)),
    ]
    for w, b in pp["rest"]:
        inputs += [w, b]
        in_specs += [
            pl.BlockSpec(w.shape, lambda i: (0, 0)),
            pl.BlockSpec(b.shape, lambda i: (0, 0)),
        ]

    # VMEM budget: resident params + double-buffered streamed tiles +
    # intermediate activations, capped at 75% of physical VMEM (v7x: 64 MiB).
    cd_bytes = jnp.dtype(compute_dtype).itemsize
    resident_bytes = sum(int(a.size) * a.dtype.itemsize for a in inputs[2:])
    streamed_bytes = 2 * (tb * (dc + dp) * cd_bytes + tb * d_out * 4)
    widest = max([pp["w0c"].shape[1]] + [w.shape[1] for w, _ in pp["rest"]])
    act_bytes = 2 * tb * widest * 4
    try:
        vmem_cap = int(pltpu.get_tpu_info().vmem_capacity_bytes)
    except Exception:
        vmem_cap = 64 << 20
    vmem_limit = int(min(int(0.75 * vmem_cap),
                         max(8 << 20,
                             2 * (resident_bytes + streamed_bytes + act_bytes))))

    # Advisory cost estimate (helps XLA schedule ops around the custom call).
    d0_pad = pp["w0c"].shape[1]
    flops = 2 * b_pad * (dc + dp) * d0_pad
    for w, _ in pp["rest"]:
        flops += 2 * b_pad * w.shape[0] * w.shape[1]
    bytes_accessed = (int(xc.size) * cd_bytes + int(xp.size) * cd_bytes
                      + resident_bytes + b_pad * d_out * 4)

    out = pl.pallas_call(
        _mlp_kernel,
        out_shape=jax.ShapeDtypeStruct((b_pad, d_out), jnp.float32),
        grid=(grid,),
        in_specs=in_specs,
        out_specs=pl.BlockSpec((tb, d_out), lambda i: (i, 0)),
        compiler_params=pltpu.CompilerParams(
            dimension_semantics=("parallel",),
            vmem_limit_bytes=vmem_limit,
        ),
        cost_estimate=pl.CostEstimate(
            flops=flops, transcendentals=0, bytes_accessed=bytes_accessed),
    )(*inputs)

    return out[:B]


def _reference_forward(params, compound_feature, protein_feature):
    x = jnp.concatenate([compound_feature, protein_feature], axis=1)
    for w, b in params[:-1]:
        x = jnp.maximum(x @ w + b, 0.0)
    w, b = params[-1]
    return x @ w + b


if __name__ == "__main__":
    # Small shapes consistent with the module's forward.
    compound_dim = 16
    protein_dim = 16
    hidden_dim = [32, 32]
    out_dim = 4

    key = jax.random.PRNGKey(0)
    key, kc, kp = jax.random.split(key, 3)

    params = init_classifier_params(key, compound_dim, protein_dim, hidden_dim, out_dim)

    # --- primary check: tiny batch, f32 compute path, tight tolerance ---
    batch = 2
    compound_feature = jax.random.normal(kc, (batch, compound_dim), jnp.float32)
    protein_feature = jax.random.normal(kp, (batch, protein_dim), jnp.float32)
    ref = _reference_forward(params, compound_feature, protein_feature)

    padded_f32 = pad_classifier_params(params, compound_dim, compute_dtype=jnp.float32)
    out = classifier_forward(padded_f32, compound_feature, protein_feature)
    jax.block_until_ready(out)
    assert out.shape == (batch, out_dim)
    assert jnp.allclose(out, ref, atol=1e-5, rtol=1e-5)

    # --- larger batch: exercises the multi-step "parallel" batch grid ---
    big_batch = 512
    key, kc2, kp2 = jax.random.split(key, 3)
    cf_big = jax.random.normal(kc2, (big_batch, compound_dim), jnp.float32)
    pf_big = jax.random.normal(kp2, (big_batch, protein_dim), jnp.float32)
    ref_big = _reference_forward(params, cf_big, pf_big)

    out_big32 = classifier_forward(padded_f32, cf_big, pf_big)
    jax.block_until_ready(out_big32)
    assert out_big32.shape == (big_batch, out_dim)
    assert jnp.allclose(out_big32, ref_big, atol=1e-4, rtol=1e-4)

    # --- default bf16 compute path (halved streamed bytes); looser tolerance
    #     expected from bf16 weights/activations, accumulation stays f32 ---
    padded_bf16 = pad_classifier_params(params, compound_dim)  # bf16 default
    out_big_bf16 = classifier_forward(padded_bf16, cf_big, pf_big)
    jax.block_until_ready(out_big_bf16)
    assert out_big_bf16.shape == (big_batch, out_dim)
    assert jnp.allclose(out_big_bf16, ref_big, atol=1e-1, rtol=1e-1)

    print("KERNEL_OK")
</pallas_src>

<mosaic_0001>
module attributes {stable_mosaic.version = 11 : i64} {
  func.func @_mlp_kernel(%arg0: i32, %arg1: memref<8x16xf32, #tpu.memory_space<vmem>>, %arg2: memref<8x16xf32, #tpu.memory_space<vmem>>, %arg3: memref<16x128xf32, #tpu.memory_space<vmem>>, %arg4: memref<16x128xf32, #tpu.memory_space<vmem>>, %arg5: memref<1x128xf32, #tpu.memory_space<vmem>>, %arg6: memref<128x128xf32, #tpu.memory_space<vmem>>, %arg7: memref<1x128xf32, #tpu.memory_space<vmem>>, %arg8: memref<128x4xf32, #tpu.memory_space<vmem>>, %arg9: memref<1x4xf32, #tpu.memory_space<vmem>>, %arg10: memref<8x4xf32, #tpu.memory_space<vmem>>) attributes {dimension_semantics = [#tpu.dimension_semantics<parallel>], iteration_bounds = array<i64: 1>, scalar_prefetch = 0 : i64, scratch_operands = 0 : i64, tpu.core_type = #tpu.core_type<tc>, window_params = [{transform_indices = @transform_0, window_bounds = array<i64: 8, 16>}, {transform_indices = @transform_1, window_bounds = array<i64: 8, 16>}, {pipeline_mode = #tpu.pipeline_mode<synchronous>, transform_indices = @transform_2, window_bounds = array<i64: 16, 128>}, {pipeline_mode = #tpu.pipeline_mode<synchronous>, transform_indices = @transform_3, window_bounds = array<i64: 16, 128>}, {pipeline_mode = #tpu.pipeline_mode<synchronous>, transform_indices = @transform_4, window_bounds = array<i64: 1, 128>}, {pipeline_mode = #tpu.pipeline_mode<synchronous>, transform_indices = @transform_5, window_bounds = array<i64: 128, 128>}, {pipeline_mode = #tpu.pipeline_mode<synchronous>, transform_indices = @transform_6, window_bounds = array<i64: 1, 128>}, {pipeline_mode = #tpu.pipeline_mode<synchronous>, transform_indices = @transform_7, window_bounds = array<i64: 128, 4>}, {pipeline_mode = #tpu.pipeline_mode<synchronous>, transform_indices = @transform_8, window_bounds = array<i64: 1, 4>}, {transform_indices = @transform_9, window_bounds = array<i64: 8, 4>}]} {
    %c0 = arith.constant 0 : index
    %c0_0 = arith.constant 0 : index
    %0 = vector.load %arg1[%c0, %c0_0] : memref<8x16xf32, #tpu.memory_space<vmem>>, vector<8x16xf32>
    %c0_1 = arith.constant 0 : index
    %c0_2 = arith.constant 0 : index
    %1 = vector.load %arg3[%c0_1, %c0_2] : memref<16x128xf32, #tpu.memory_space<vmem>>, vector<16x128xf32>
    %cst = arith.constant dense<0.000000e+00> : vector<8x128xf32>
    %2 = tpu.matmul %0, %1, %cst {dimension_numbers = #tpu.dot_dimension_numbers<[1], [0], [0], [1], [0, 0, 1, 1], [], []>} : vector<8x16xf32>, vector<16x128xf32>, vector<8x128xf32> -> vector<8x128xf32>
    %c0_3 = arith.constant 0 : index
    %c0_4 = arith.constant 0 : index
    %3 = vector.load %arg2[%c0_3, %c0_4] : memref<8x16xf32, #tpu.memory_space<vmem>>, vector<8x16xf32>
    %c0_5 = arith.constant 0 : index
    %c0_6 = arith.constant 0 : index
    %4 = vector.load %arg4[%c0_5, %c0_6] : memref<16x128xf32, #tpu.memory_space<vmem>>, vector<16x128xf32>
    %cst_7 = arith.constant dense<0.000000e+00> : vector<8x128xf32>
    %5 = tpu.matmul %3, %4, %cst_7 {dimension_numbers = #tpu.dot_dimension_numbers<[1], [0], [0], [1], [0, 0, 1, 1], [], []>} : vector<8x16xf32>, vector<16x128xf32>, vector<8x128xf32> -> vector<8x128xf32>
    %6 = arith.addf %2, %5 : vector<8x128xf32>
    %c0_8 = arith.constant 0 : index
    %c0_9 = arith.constant 0 : index
    %7 = vector.load %arg5[%c0_8, %c0_9] : memref<1x128xf32, #tpu.memory_space<vmem>>, vector<1x128xf32>
    %8 = vector.broadcast %7 : vector<1x128xf32> to vector<8x128xf32>
    %9 = arith.addf %6, %8 : vector<8x128xf32>
    %cst_10 = arith.constant 0.000000e+00 : f32
    %10 = vector.broadcast %cst_10 : f32 to vector<8x128xf32>
    %11 = arith.maximumf %9, %10 : vector<8x128xf32>
    %c0_11 = arith.constant 0 : index
    %c0_12 = arith.constant 0 : index
    %12 = vector.load %arg6[%c0_11, %c0_12] : memref<128x128xf32, #tpu.memory_space<vmem>>, vector<128x128xf32>
    %cst_13 = arith.constant dense<0.000000e+00> : vector<8x128xf32>
    %13 = tpu.matmul %11, %12, %cst_13 {dimension_numbers = #tpu.dot_dimension_numbers<[1], [0], [0], [1], [0, 0, 1, 1], [], []>} : vector<8x128xf32>, vector<128x128xf32>, vector<8x128xf32> -> vector<8x128xf32>
    %c0_14 = arith.constant 0 : index
    %c0_15 = arith.constant 0 : index
    %14 = vector.load %arg7[%c0_14, %c0_15] : memref<1x128xf32, #tpu.memory_space<vmem>>, vector<1x128xf32>
    %15 = vector.broadcast %14 : vector<1x128xf32> to vector<8x128xf32>
    %16 = arith.addf %13, %15 : vector<8x128xf32>
    %cst_16 = arith.constant 0.000000e+00 : f32
    %17 = vector.broadcast %cst_16 : f32 to vector<8x128xf32>
    %18 = arith.maximumf %16, %17 : vector<8x128xf32>
    %c0_17 = arith.constant 0 : index
    %c0_18 = arith.constant 0 : index
    %19 = vector.load %arg8[%c0_17, %c0_18] : memref<128x4xf32, #tpu.memory_space<vmem>>, vector<128x4xf32>
    %cst_19 = arith.constant dense<0.000000e+00> : vector<8x4xf32>
    %20 = tpu.matmul %18, %19, %cst_19 {dimension_numbers = #tpu.dot_dimension_numbers<[1], [0], [0], [1], [0, 0, 1, 1], [], []>} : vector<8x128xf32>, vector<128x4xf32>, vector<8x4xf32> -> vector<8x4xf32>
    %c0_20 = arith.constant 0 : index
    %c0_21 = arith.constant 0 : index
    %21 = vector.load %arg9[%c0_20, %c0_21] : memref<1x4xf32, #tpu.memory_space<vmem>>, vector<1x4xf32>
    %22 = vector.broadcast %21 : vector<1x4xf32> to vector<8x4xf32>
    %23 = arith.addf %20, %22 : vector<8x4xf32>
    %c0_22 = arith.constant 0 : index
    %c0_23 = arith.constant 0 : index
    %24 = vector.load %arg10[%c0_22, %c0_23] : memref<8x4xf32, #tpu.memory_space<vmem>>, vector<8x4xf32>
    tpu.vector_store %arg10[%c0_22, %c0_23], %23 {strides = array<i32>} : memref<8x4xf32, #tpu.memory_space<vmem>>, vector<8x4xf32>,
    return
  }
  func.func @transform_0(%arg0: i32) -> (i32, i32) {
    %c0_i32 = arith.constant 0 : i32
    %c0_i32_0 = arith.constant 0 : i32
    return %arg0, %c0_i32 : i32, i32
  }
  func.func @transform_1(%arg0: i32) -> (i32, i32) {
    %c0_i32 = arith.constant 0 : i32
    %c0_i32_0 = arith.constant 0 : i32
    return %arg0, %c0_i32 : i32, i32
  }
  func.func @transform_2(%arg0: i32) -> (i32, i32) {
    %c0_i32 = arith.constant 0 : i32
    %c0_i32_0 = arith.constant 0 : i32
    %c0_i32_1 = arith.constant 0 : i32
    return %c0_i32, %c0_i32_0 : i32, i32
  }
  func.func @transform_3(%arg0: i32) -> (i32, i32) {
    %c0_i32 = arith.constant 0 : i32
    %c0_i32_0 = arith.constant 0 : i32
    %c0_i32_1 = arith.constant 0 : i32
    return %c0_i32, %c0_i32_0 : i32, i32
  }
  func.func @transform_4(%arg0: i32) -> (i32, i32) {
    %c0_i32 = arith.constant 0 : i32
    %c0_i32_0 = arith.constant 0 : i32
    %c0_i32_1 = arith.constant 0 : i32
    return %c0_i32, %c0_i32_0 : i32, i32
  }
  func.func @transform_5(%arg0: i32) -> (i32, i32) {
    %c0_i32 = arith.constant 0 : i32
    %c0_i32_0 = arith.constant 0 : i32
    %c0_i32_1 = arith.constant 0 : i32
    return %c0_i32, %c0_i32_0 : i32, i32
  }
  func.func @transform_6(%arg0: i32) -> (i32, i32) {
    %c0_i32 = arith.constant 0 : i32
    %c0_i32_0 = arith.constant 0 : i32
    %c0_i32_1 = arith.constant 0 : i32
    return %c0_i32, %c0_i32_0 : i32, i32
  }
  func.func @transform_7(%arg0: i32) -> (i32, i32) {
    %c0_i32 = arith.constant 0 : i32
    %c0_i32_0 = arith.constant 0 : i32
    %c0_i32_1 = arith.constant 0 : i32
    return %c0_i32, %c0_i32_0 : i32, i32
  }
  func.func @transform_8(%arg0: i32) -> (i32, i32) {
    %c0_i32 = arith.constant 0 : i32
    %c0_i32_0 = arith.constant 0 : i32
    %c0_i32_1 = arith.constant 0 : i32
    return %c0_i32, %c0_i32_0 : i32, i32
  }
  func.func @transform_9(%arg0: i32) -> (i32, i32) {
    %c0_i32 = arith.constant 0 : i32
    %c0_i32_0 = arith.constant 0 : i32
    return %arg0, %c0_i32 : i32, i32
  }
}

</mosaic_0001>

<bundles_post_ra>
// kernel: tpu_custom_call.1
= control target key start
LH: loop header
LB: loop body
LE: loop exit
PB: predicated region body
PF: predicated region fallthrough
CT: control target
= control target key end

     0   :  { %14 = vsyncpa [#allocation3], 0  ;;  %s917_s0 = inlined_call_operand.hbm [shape: f32[8,16], index: 0, kind: input, shape index: {}]   ;;  %s918_s1 = inlined_call_operand.hbm [shape: f32[8,16], index: 1, kind: input, shape index: {}]   ;;  %s919_s2 = inlined_call_operand.vmem [shape: f32[16,128], index: 2, kind: input, shape index: {}]   ;;  %s920_s3 = inlined_call_operand.hbm [shape: f32[16,128], index: 3, kind: input, shape index: {}]   ;;  %s921_s4 = inlined_call_operand.vmem [shape: f32[1,128], index: 4, kind: input, shape index: {}]   ;;  %s922_s5 = inlined_call_operand.vmem [shape: f32[128,128], index: 5, kind: input, shape index: {}]   ;;  %s923_s6 = inlined_call_operand.vmem [shape: f32[1,128], index: 6, kind: input, shape index: {}]   ;;  %s924_s7 = inlined_call_operand.vmem [shape: f32[128,4], index: 7, kind: input, shape index: {}]   ;;  %s925_s8 = inlined_call_operand.vmem [shape: f32[1,4], index: 8, kind: input, shape index: {}]   ;;  %s926_s9 = inlined_call_operand.vmem [shape: f32[8,4], index: 9, kind: output, shape index: {}]  }
   0x1   :  { %15 = vsyncpa [#allocation5], 0  ;;  %s687_s30 = smov [#allocation4]   ;;  %s688_s11 = smov [#allocation2]  }
   0x2   :  { %s32_s10 = sshll.u32 %s687_s30, 4  ;;  %s22_s12 = sshll.u32 %s688_s11, 4  ;;  %s33_s10 = int_to_ptr.vmem [resolvable:$true] %s32_s10  ;;  %s23_s12 = int_to_ptr.vmem [resolvable:$true] %s22_s12 }
   0x3   :  { %s617_s15 = scalar_lea.hbm %s918_s1, 128 }
   0x4   :  { %p618_p0 = scmp.ne.s32.totalorder %s918_s1, %s617_s15  ;;  %p621_p1 = scmp.lt.u32.totalorder %s617_s15, %s918_s1 }
   0x6   :  { %p623_p2 = pnand %p621_p1, %p618_p0 }
   0x8   :  { %626 = shalt.err (!%p623_p2)
}
   0x9   :  { %s627_s20 = scalar_lea.vmem %s33_s10, 128  ;;  %p632_p4 = scmp.lt.s32.totalorder %s33_s10, %s33_s10 }
   0xa   :  { %p628_p3 = scmp.ne.s32.totalorder %s33_s10, %s627_s20  ;;  %p633_p5 = scmp.lt.s32.totalorder %s627_s20, %s627_s20 }
   0xc   :  { %p634_p6 = por %p633_p5, %p632_p4 }
   0xe   :  { %p635_p7 = pnand %p634_p6, %p628_p3 }
  0x10   :  { %638 = shalt.err (!%p635_p7)
}
  0x11   :  { %35 = dma.hbm_to_vmem [thread:$0]  %s918_s1, 128, %s33_s10, [#allocation5]  }
  0x12   :  { %s639_s25 = scalar_lea.hbm %s917_s0, 128 }
  0x13   :  { %p640_p8 = scmp.ne.s32.totalorder %s917_s0, %s639_s25  ;;  %p643_p9 = scmp.lt.u32.totalorder %s639_s25, %s917_s0 }
  0x15   :  { %p645_p10 = pnand %p643_p9, %p640_p8 }
  0x17   :  { %648 = shalt.err (!%p645_p10)
}
  0x18   :  { %s649_s30 = scalar_lea.vmem %s23_s12, 128  ;;  %p654_p12 = scmp.lt.s32.totalorder %s23_s12, %s23_s12 }
  0x19   :  { %p650_p11 = scmp.ne.s32.totalorder %s23_s12, %s649_s30  ;;  %p655_p13 = scmp.lt.s32.totalorder %s649_s30, %s649_s30 }
  0x1b   :  { %p656_p0 = por %p655_p13, %p654_p12 }
  0x1d   :  { %p657_p1 = pnand %p656_p0, %p650_p11 }
  0x1f   :  { %660 = shalt.err (!%p657_p1)
}
  0x20   :  { %25 = dma.hbm_to_vmem [thread:$0]  %s917_s0, 128, %s23_s12, [#allocation3]  }
  0x21   :  { %s689_s11 = smov [#allocation6]   ;;  %s661_s16 = scalar_lea.hbm %s920_s3, 256 }
  0x22   :  { %s43_s13 = sshll.u32 %s689_s11, 4  ;;  %p662_p2 = scmp.ne.s32.totalorder %s920_s3, %s661_s16  ;;  %s44_s13 = int_to_ptr.vmem [resolvable:$true] %s43_s13 }
  0x23   :  { %p665_p3 = scmp.lt.u32.totalorder %s661_s16, %s920_s3 }
  0x25   :  { %p667_p4 = pnand %p665_p3, %p662_p2 }
  0x27   :  { %670 = shalt.err (!%p667_p4)
}
  0x28   :  { %s671_s21 = scalar_lea.vmem %s44_s13, 256  ;;  %p676_p6 = scmp.lt.s32.totalorder %s44_s13, %s44_s13 }
  0x29   :  { %p672_p5 = scmp.ne.s32.totalorder %s44_s13, %s671_s21  ;;  %p677_p7 = scmp.lt.s32.totalorder %s671_s21, %s671_s21 }
  0x2b   :  { %p678_p8 = por %p677_p7, %p676_p6 }
  0x2d   :  { %p679_p9 = pnand %p678_p8, %p672_p5 }
  0x2f   :  { %682 = shalt.err (!%p679_p9)
}
  0x30   :  { %s690_s0 = smov 128   ;;  %s691_s12 = smov 8  }
  0x31   :  { %49 = dma.hbm_to_vmem [thread:$0]  %s920_s3, 256, %s44_s13, [#allocation5], %s690_s0, %s690_s0, %s691_s12  }
  0x32   :  { %683 = dma.done.wait [#allocation3], 128  }
  0x33   :  { %684 = vsyncadd [#allocation3], 4294967168 }
  0x34   :  { %685 = dma.done.wait [#allocation5], 384  }
  0x35   :  { %686 = vsyncadd [#allocation5], 4294966912  ;;  %v692_v0 = vmov 0.0|0.0   ;;  %vm693_vm0 = vmmov 0   ;;  %v694_v1 = vmov 0.0   ;;  %v73_v2 = vld [vmem:[#allocation6] sm:$0xff] }
  0x36   :  { %555 = vmatprep.subr.bf16.mxu0 %v692_v0  ;;  %558 = vmatprep.subr.bf16.mxu1 %v692_v0  ;;  %v74_v3 = vld [vmem:[#allocation6 + $0x8] sm:$0xff]  ;;  %v70_v4 = vld [vmem:[%s919_s2] sm:$0xff]  ;;  %v71_v6 = vld [vmem:[%s919_s2 + $0x8] sm:$0xff]  ;;  %vm75_vm1 = vcmask 130048   ;;  %vm418_vm2 = vcmask 31744  }
  0x37   :  { %475 = vmatprep.mubr.msk.f32.mxu0 %vm693_vm0, %v694_v1  ;;  %482 = vmatprep.mubr.msk.f32.mxu1 %vm693_vm0, %v694_v1  ;;  %v556_v5 = vpack.c.bf16 %v74_v3, %v73_v2  ;;  %v559_v7 = vpack.c.bf16 %v71_v6, %v70_v4  ;;  %v231_v8 = vld [vmem:[%s922_s5] sm:$0xff]  ;;  %v232_v9 = vld [vmem:[%s922_s5 + $0x8] sm:$0xff]  ;;  %v233_v13 = vld [vmem:[%s922_s5 + $0x10] sm:$0xff] }
  0x38   :  { %v72_v10 = vld [vmem:[#allocation4] sm:$0xff]  ;;  %v562_v11 = vpack.c.bf16 %v232_v9, %v231_v8  ;;  %v69_v12 = vld [vmem:[#allocation2] sm:$0xff]  ;;  %v234_v14 = vld [vmem:[%s922_s5 + $0x18] sm:$0xff] }
  0x39   :  { %557 = vmatpush3.bf16.msra.mxu0 %v556_v5  ;;  %560 = vmatpush3.bf16.msra.mxu1 %v559_v7  ;;  %v565_v15 = vpack.c.bf16 %v234_v14, %v233_v13  ;;  %v235_v16 = vld [vmem:[%s922_s5 + $0x20] sm:$0xff]  ;;  %v236_v17 = vld [vmem:[%s922_s5 + $0x28] sm:$0xff]  ;;  %v237_v19 = vld [vmem:[%s922_s5 + $0x30] sm:$0xff] }
  0x3a   :  { %561 = vmatprep.subr.bf16.mxu0 %v692_v0  ;;  %585 = vmatprep.subr.bf16.mxu1 %v692_v0  ;;  %v568_v18 = vpack.c.bf16 %v236_v17, %v235_v16  ;;  %v238_v20 = vld [vmem:[%s922_s5 + $0x38] sm:$0xff]  ;;  %v239_v22 = vld [vmem:[%s922_s5 + $0x40] sm:$0xff]  ;;  %v240_v23 = vld [vmem:[%s922_s5 + $0x48] sm:$0xff] }
  0x3b   :  { %v571_v21 = vpack.c.bf16 %v238_v20, %v237_v19  ;;  %v574_v24 = vpack.c.bf16 %v240_v23, %v239_v22  ;;  %v241_v25 = vld [vmem:[%s922_s5 + $0x50] sm:$0xff]  ;;  %v242_v26 = vld [vmem:[%s922_s5 + $0x58] sm:$0xff]  ;;  %v243_v28 = vld [vmem:[%s922_s5 + $0x60] sm:$0xff] }
  0x3c   :  { %476 = vmatmul.mubr.msk.f32.vlgmr.msra.gmra.mrb[0].mxu0 %vm75_vm1, %v72_v10  ;;  %483 = vmatmul.mubr.msk.f32.vlgmr.msra.gmra.mrb[0].mxu1 %vm75_vm1, %v69_v12  ;;  %v577_v27 = vpack.c.bf16 %v242_v26, %v241_v25  ;;  %v244_v29 = vld [vmem:[%s922_s5 + $0x68] sm:$0xff]  ;;  %v245_v31 = vld [vmem:[%s922_s5 + $0x70] sm:$0xff]  ;;  %v246_v32 = vld [vmem:[%s922_s5 + $0x78] sm:$0xff] }
  0x3d   :  { %563 = vmatpush3.bf16.msra.mxu0 %v562_v11  ;;  %517 = vmatprep.mubr.msk.f32.mxu0 %vm693_vm0, %v694_v1  ;;  %v580_v30 = vpack.c.bf16 %v244_v29, %v243_v28  ;;  %v583_v33 = vpack.c.bf16 %v246_v32, %v245_v31  ;;  %v325_v34 = vld [vmem:[%s924_s7] sm:$0xff]  ;;  %v326_v35 = vld [vmem:[%s924_s7 + $0x8] sm:$0xff]  ;;  %v327_v36 = vld [vmem:[%s924_s7 + $0x10] sm:$0xff] }
  0x3e   :  { %564 = vmatprep.subr.bf16.mxu0 %v692_v0  ;;  %552 = vmatprep.mubr.msk.f32.mxu1 %vm693_vm0, %v694_v1  ;;  %v586_v37 = vpack.c.bf16 %v326_v35, %v325_v34  ;;  %v328_v38 = vld [vmem:[%s924_s7 + $0x18] sm:$0xff]  ;;  %v329_v40 = vld [vmem:[%s924_s7 + $0x20] sm:$0xff]  ;;  %v330_v41 = vld [vmem:[%s924_s7 + $0x28] sm:$0xff] }
  0x3f   :  { %v589_v39 = vpack.c.bf16 %v328_v38, %v327_v36  ;;  %v592_v42 = vpack.c.bf16 %v330_v41, %v329_v40  ;;  %v331_v43 = vld [vmem:[%s924_s7 + $0x30] sm:$0xff]  ;;  %v332_v44 = vld [vmem:[%s924_s7 + $0x38] sm:$0xff]  ;;  %v333_v46 = vld [vmem:[%s924_s7 + $0x40] sm:$0xff] }
  0x40   :  { %587 = vmatpush3.bf16.msra.mxu1 %v586_v37  ;;  %v595_v45 = vpack.c.bf16 %v332_v44, %v331_v43  ;;  %v334_v47 = vld [vmem:[%s924_s7 + $0x48] sm:$0xff]  ;;  %v335_v49 = vld [vmem:[%s924_s7 + $0x50] sm:$0xff]  ;;  %v336_v50 = vld [vmem:[%s924_s7 + $0x58] sm:$0xff] }
  0x41   :  { %566 = vmatpush3.bf16.msra.mxu0 %v565_v15  ;;  %588 = vmatprep.subr.bf16.mxu1 %v692_v0  ;;  %v598_v48 = vpack.c.bf16 %v334_v47, %v333_v46  ;;  %v601_v51 = vpack.c.bf16 %v336_v50, %v335_v49  ;;  %v337_v52 = vld [vmem:[%s924_s7 + $0x60] sm:$0xff]  ;;  %v338_v53 = vld [vmem:[%s924_s7 + $0x68] sm:$0xff]  ;;  %v339_v63 = vld [vmem:[%s924_s7 + $0x70] sm:$0xff] }
  0x42   :  { %567 = vmatprep.subr.bf16.mxu0 %v692_v0  ;;  %v604_v54 = vpack.c.bf16 %v338_v53, %v337_v52  ;;  %v428_v57 = vld [vmem:[%s921_s4] ss:$0 sm:$0xff] }
  0x43   :  { %v429_v2 = vld [vmem:[%s923_s6] ss:$0 sm:$0xff] }
  0x44   :  { %590 = vmatpush3.bf16.msra.mxu1 %v589_v39  ;;  %v430_v7 = vld [vmem:[%s925_s8] ss:$0 sm:$0xff] }
  0x45   :  { %569 = vmatpush3.bf16.msra.mxu0 %v568_v18  ;;  %591 = vmatprep.subr.bf16.mxu1 %v692_v0 }
  0x46   :  { %570 = vmatprep.subr.bf16.mxu0 %v692_v0 }
  0x48   :  { %593 = vmatpush3.bf16.msra.mxu1 %v592_v42 }
  0x49   :  { %572 = vmatpush3.bf16.msra.mxu0 %v571_v21  ;;  %594 = vmatprep.subr.bf16.mxu1 %v692_v0 }
  0x4a   :  { %573 = vmatprep.subr.bf16.mxu0 %v692_v0 }
  0x4c   :  { %596 = vmatpush3.bf16.msra.mxu1 %v595_v45 }
  0x4d   :  { %575 = vmatpush3.bf16.msra.mxu0 %v574_v24  ;;  %597 = vmatprep.subr.bf16.mxu1 %v692_v0 }
  0x4e   :  { %576 = vmatprep.subr.bf16.mxu0 %v692_v0 }
  0x50   :  { %599 = vmatpush3.bf16.msra.mxu1 %v598_v48 }
  0x51   :  { %578 = vmatpush3.bf16.msra.mxu0 %v577_v27  ;;  %600 = vmatprep.subr.bf16.mxu1 %v692_v0 }
  0x52   :  { %579 = vmatprep.subr.bf16.mxu0 %v692_v0 }
  0x54   :  { %602 = vmatpush3.bf16.msra.mxu1 %v601_v51 }
  0x55   :  { %581 = vmatpush3.bf16.msra.mxu0 %v580_v30  ;;  %603 = vmatprep.subr.bf16.mxu1 %v692_v0 }
  0x56   :  { %582 = vmatprep.subr.bf16.mxu0 %v692_v0 }
  0x58   :  { %605 = vmatpush3.bf16.msra.mxu1 %v604_v54 }
  0x59   :  { %584 = vmatpush3.bf16.msra.mxu0 %v583_v33  ;;  %606 = vmatprep.subr.bf16.mxu1 %v692_v0  ;;  %v340_v0 = vld [vmem:[%s924_s7 + $0x78] sm:$0xff] }
  0x5a   :  { %v607_v1 = vpack.c.bf16 %v340_v0, %v339_v63 }
  0x5c   :  { %608 = vmatpush3.bf16.msra.mxu1 %v607_v1 }
 0x10f   :  { %v145_v55 = vpop.f32.mrb[0].mxu0  ;;  %v218_v56 = vpop.f32.mrb[0].mxu1 }
 0x110   :  { %v477_v58 = vpop.f32.mrb[1].mxu0  ;;  %v219_v59 = vadd.f32 %v218_v56, %v145_v55  ;;  %v484_v60 = vpop.f32.mrb[1].mxu1 }
 0x112   :  { %v229_v61 = vadd.f32 %v428_v57, %v219_v59 }
 0x114   :  { %v230_v62 = vmax.f32 %v229_v61, 0.0 }
 0x116   :  { %518 = vmatmul.mubr.f32.vlgmr.msra.gmra.mrb[2].mxu0 %v230_v62 }
 0x1e9   :  { %v320_v3 = vpop.f32.mrb[2].mxu0 }
 0x1ea   :  { %v321_v4 = vadd.f32 %v429_v2, %v320_v3  ;;  %v519_v5 = vpop.f32.mrb[3].mxu0 }
 0x1ec   :  { %v324_v6 = vmax.f32 %v321_v4, 0.0 }
 0x1ee   :  { %553 = vmatmul.mubr.f32.vlgmr.msra.gmra.mrb[2].mxu1 %v324_v6 }
 0x2c1   :  { %v414_v8 = vpop.f32.mrb[2].mxu1 }
 0x2c2   :  { %v415_v9 = vadd.f32 %v430_v7, %v414_v8  ;;  %v554_v10 = vpop.f32.mrb[3].mxu1 }
 0x2c4   :  { %419 = vst.msk [vmem:[%s926_s9] sm:$0xff] %vm418_vm2, %v415_v9 }
 0x2c5   :  { %424 = vsyncpa [#allocation3], 1 }
 0x2c6   :  { %425 = vsyncpa [#allocation5], 1 }

</bundles_post_ra>
